<compile_context>
chip_gen: v5e
topology: v5e:2x2
jax: 0.10.0
libtpu: 0.0.40
codegen_flags: <defaults>
</compile_context>

<pallas_src>
import math

import jax
import jax.numpy as jnp
from jax.experimental import pallas as pl
from jax.experimental.pallas import tpu as pltpu


# ------------------------------ kernels --------------------------------------


def _make_attention_kernel(inv_scale, clip):
    """softmax(mask_fill(clip*tanh(QK^T*inv_scale))) @ V, heads pre-combined."""

    def kernel(q_ref, k_ref, v_ref, bias_ref, o_ref):
        BB, H, Sq, D = q_ref.shape            # (BB, H, Sq, D)
        Sk = k_ref.shape[-1]                  # K is (BB, H, D, Sk): Sk in lanes
        G = BB * H

        # Scale q (H*Sq*D elems) instead of the (H,Sq,Sk) logits.
        q = q_ref[...].reshape(G, Sq, D) * inv_scale
        k = k_ref[...].reshape(G, D, Sk)
        v = v_ref[...].reshape(G, Sk, D)

        # bf16 x bf16 -> f32 accumulate on the MXU; single batch dim (= BB*H).
        logits = jnp.einsum("gqd,gdk->gqk", q, k,
                            preferred_element_type=jnp.float32)
        if clip is not None:
            logits = clip * jnp.tanh(logits)

        # masked_fill semantics: masked keys replaced with -inf value.
        neg = jnp.broadcast_to(bias_ref[...][:, None, :, :],
                               (BB, H, 1, Sk)).reshape(G, 1, Sk)
        logits = jnp.where(neg < 0.0, neg, logits)

        # Numerically stable softmax; reciprocal on the EUP (free slot).
        lmax = jnp.max(logits, axis=-1, keepdims=True)
        e = jnp.exp(logits - lmax)
        denom = jnp.sum(e, axis=-1, keepdims=True)
        probs = e * pl.reciprocal(denom, approx=True)

        out = jnp.einsum("gqk,gkd->gqd", probs.astype(v.dtype), v,
                         preferred_element_type=jnp.float32)     # (G, Sq, D)

        # combine_heads fused: one relayout + one lane-dense (Sq, H*D) store.
        out = jnp.transpose(out.reshape(BB, H, Sq, D), (0, 2, 1, 3))
        o_ref[...] = out.reshape(BB, Sq, H * D).astype(o_ref.dtype)

    return kernel


def _make_logits_kernel(inv_scale, clip):
    """return_logits=True path: masked (optionally clipped) logits."""

    def kernel(q_ref, k_ref, bias_ref, o_ref):
        BB, H, Sq, D = q_ref.shape
        Sk = k_ref.shape[-1]
        G = BB * H

        q = q_ref[...].reshape(G, Sq, D) * inv_scale
        k = k_ref[...].reshape(G, D, Sk)
        logits = jnp.einsum("gqd,gdk->gqk", q, k,
                            preferred_element_type=jnp.float32)
        if clip is not None:
            logits = clip * jnp.tanh(logits)

        neg = jnp.broadcast_to(bias_ref[...][:, None, :, :],
                               (BB, H, 1, Sk)).reshape(G, 1, Sk)
        logits = jnp.where(neg < 0.0, neg, logits)        # exact masked_fill
        o_ref[...] = logits.reshape(BB, H, Sq, Sk).astype(o_ref.dtype)

    return kernel


# --------------------------- sizing helpers -----------------------------------


def _ru(x, m):
    return ((x + m - 1) // m) * m


def _vmem_budget_bytes():
    try:
        cap = pltpu.get_tpu_info().vmem_capacity_bytes
    except Exception:
        cap = 64 * 1024 * 1024            # conservative: v7x per-core VMEM
    return (3 * cap) // 4                 # ~48 MiB on v7x, ~96 MiB on v5e/v6e


def _vmem_estimate(bb, H, Sq, Sk, D, return_logits, io_bytes, out_bytes):
    """Rough per-step VMEM, including (8,128) tile padding and double buffers."""
    q = bb * H * _ru(Sq, 8) * _ru(D, 128) * io_bytes
    k = bb * H * _ru(D, 8) * _ru(Sk, 128) * io_bytes
    bias = bb * 8 * _ru(Sk, 128) * 4
    logits = bb * H * _ru(Sq, 8) * _ru(Sk, 128) * 4
    if return_logits:
        ins = q + k + bias
        out = logits
        tmp = 2 * logits
    else:
        v = bb * H * _ru(Sk, 8) * _ru(D, 128) * io_bytes
        ins = q + k + v + bias
        out = bb * _ru(Sq, 8) * _ru(H * D, 128) * out_bytes
        tmp = 4 * logits + 2 * out
    return 2 * (ins + out) + tmp


def _pick_batch_block(B, H, Sq, Sk, D, return_logits, io_bytes, out_bytes, budget):
    for bb in (16, 8, 4, 2, 1):
        if B % bb != 0:
            continue
        if B >= 2 and B // bb < 2:
            continue        # keep >= 2 grid steps so both v7x TensorCores get work
        if _vmem_estimate(bb, H, Sq, Sk, D, return_logits,
                          io_bytes, out_bytes) <= budget:
            return bb
    return 1


# --------------------------- DotProductAttention ------------------------------


def dot_product_attention(Q, K, V, mask=None, *, clip=None, return_logits=False,
                          inf=1e10, compute_dtype=jnp.bfloat16):
    """Pallas DotProductAttention.

    Q/K/V: (batch, n_heads, seq, head_depth); mask: (batch, n_nodes, 1) bool.
    Returns:
      return_logits=False -> heads already combined: (batch, q_seq, n_heads*head_depth)
      return_logits=True  -> masked logits: (batch, n_heads, q_seq, k_seq), float32
    """
    B, H, Sq, D = Q.shape
    Sk = K.shape[2]
    out_dtype = Q.dtype
    inv_scale = 1.0 / math.sqrt(D)

    # bf16 operands: MXU-native and half the HBM/VMEM traffic.  K is stored
    # (B, H, D, Sk) so the key axis is lane-dense inside the kernel; the
    # transpose/cast fuse with the surrounding split_heads copy in XLA.
    Qc = Q.astype(compute_dtype)
    Kt = jnp.swapaxes(K, -1, -2).astype(compute_dtype)
    Vc = None if return_logits else V.astype(compute_dtype)

    # Key bias computed once per call: 0.0 = visible, -inf value = masked.
    if mask is not None:
        key_bias = jnp.where(mask[:, :, 0], jnp.float32(-inf), jnp.float32(0.0))
    else:
        key_bias = jnp.zeros((B, Sk), jnp.float32)
    key_bias = key_bias[:, None, :]                       # (B, 1, Sk)

    io_bytes = jnp.dtype(compute_dtype).itemsize
    out_bytes = 4 if return_logits else jnp.dtype(out_dtype).itemsize
    budget = _vmem_budget_bytes()
    BB = _pick_batch_block(B, H, Sq, Sk, D, return_logits,
                           io_bytes, out_bytes, budget)
    grid = (B // BB,)

    # All non-batch dims are full-extent blocks -> no wrapper-side padding needed.
    q_spec = pl.BlockSpec((BB, H, Sq, D), lambda b: (b, 0, 0, 0))
    k_spec = pl.BlockSpec((BB, H, D, Sk), lambda b: (b, 0, 0, 0))
    v_spec = pl.BlockSpec((BB, H, Sk, D), lambda b: (b, 0, 0, 0))
    bias_spec = pl.BlockSpec((BB, 1, Sk), lambda b: (b, 0, 0))

    if return_logits:
        kernel = _make_logits_kernel(inv_scale, clip)
        out_shape = jax.ShapeDtypeStruct((B, H, Sq, Sk), jnp.float32)
        out_spec = pl.BlockSpec((BB, H, Sq, Sk), lambda b: (b, 0, 0, 0))
        operands = (Qc, Kt, key_bias)
        in_specs = [q_spec, k_spec, bias_spec]
    else:
        kernel = _make_attention_kernel(inv_scale, clip)
        out_shape = jax.ShapeDtypeStruct((B, Sq, H * D), out_dtype)
        out_spec = pl.BlockSpec((BB, Sq, H * D), lambda b: (b, 0, 0))
        operands = (Qc, Kt, Vc, key_bias)
        in_specs = [q_spec, k_spec, v_spec, bias_spec]

    # TODO(synk): for encoder self-attention with very large n_nodes (>~1000 on
    # v7x) add a q/k-tiled grid with online-softmax accumulators instead of
    # materializing the full (H, Sq, Sk) logits per step.
    return pl.pallas_call(
        kernel,
        out_shape=out_shape,
        grid=grid,
        in_specs=in_specs,
        out_specs=out_spec,
        compiler_params=pltpu.CompilerParams(
            dimension_semantics=("parallel",),
            vmem_limit_bytes=int(budget)),
    )(*operands)


# ------------------------- MultiHeadAttention wrapper -------------------------


def init_mha_params(key, n_heads=8, embed_dim=128):
    """Weights mirroring MultiHeadAttention.init_parameters (need_W=True).
    Stored as (in, out) and applied as x @ W (same distribution as torch)."""
    head_depth = embed_dim // n_heads
    stdv_w = 1.0 / math.sqrt(head_depth)
    stdv_o = 1.0 / math.sqrt(embed_dim)
    kq, kk, kv, ko = jax.random.split(key, 4)
    u = jax.random.uniform
    return {
        "Wq": u(kq, (embed_dim, embed_dim), jnp.float32, -stdv_w, stdv_w),
        "Wk": u(kk, (embed_dim, embed_dim), jnp.float32, -stdv_w, stdv_w),
        "Wv": u(kv, (embed_dim, embed_dim), jnp.float32, -stdv_w, stdv_w),
        "Wout": u(ko, (embed_dim, embed_dim), jnp.float32, -stdv_o, stdv_o),
    }


def _split_heads(T, n_heads):
    B, S, E = T.shape
    return T.reshape(B, S, n_heads, E // n_heads).transpose(0, 2, 1, 3)


def multi_head_attention(x, mask=None, *, n_heads=8, embed_dim=128, clip=None,
                         return_logits=False, need_W=False, params=None,
                         inf=1e10, compute_dtype=jnp.bfloat16):
    """Pallas equivalent of MultiHeadAttention.forward(x=[Q, K, V], mask)."""
    Q, K, V = x
    if need_W:
        Q = Q @ params["Wq"]
        K = K @ params["Wk"]
        V = V @ params["Wv"]
    Qh, Kh, Vh = (_split_heads(t, n_heads) for t in (Q, K, V))

    out = dot_product_attention(Qh, Kh, Vh, mask, clip=clip,
                                return_logits=return_logits, inf=inf,
                                compute_dtype=compute_dtype)
    if return_logits:
        # mirror combine_heads on the (B,H,Sq,Sk) logits, as the PyTorch code does
        Bq, Hh, Sq, Sk = out.shape
        return out.transpose(0, 2, 1, 3).reshape(Bq, Sq, Hh * Sk)

    # The kernel already emitted the combine_heads layout: (B, q_seq, embed_dim).
    if need_W:
        out = out @ params["Wout"]
    return out


# ----------------------------- pure-JAX references ----------------------------
# References mirror the kernel's compute precision (bf16 matmul operands, f32
# accumulation) so the comparison isolates kernel correctness from the
# intentional bf16 design choice.


def _mha_reference(x, mask, params, n_heads, embed_dim, clip=None,
                   return_logits=False, need_W=False, inf=1e10,
                   compute_dtype=jnp.bfloat16):
    Q, K, V = x
    if need_W:
        Q, K, V = Q @ params["Wq"], K @ params["Wk"], V @ params["Wv"]
    Qh, Kh, Vh = (_split_heads(t, n_heads) for t in (Q, K, V))
    D = embed_dim // n_heads
    q = Qh.astype(compute_dtype) * (1.0 / math.sqrt(D))
    logits = jnp.einsum("bhqd,bhkd->bhqk", q, Kh.astype(compute_dtype),
                        preferred_element_type=jnp.float32)
    if clip is not None:
        logits = clip * jnp.tanh(logits)
    if mask is not None:
        m = mask[:, :, 0][:, None, None, :]
        logits = jnp.where(m, jnp.float32(-inf), logits)
    if return_logits:
        B, H, Sq, Sk = logits.shape
        return logits.transpose(0, 2, 1, 3).reshape(B, Sq, H * Sk)
    probs = jax.nn.softmax(logits, axis=-1)
    out = jnp.einsum("bhqk,bhkd->bhqd", probs.astype(compute_dtype),
                     Vh.astype(compute_dtype),
                     preferred_element_type=jnp.float32)
    B, H, Sq, Dh = out.shape
    out = out.transpose(0, 2, 1, 3).reshape(B, Sq, H * Dh)
    if need_W:
        out = out @ params["Wout"]
    return out


def _logits_reference(Qh, Kh, mask, clip, inf=1e10, compute_dtype=jnp.bfloat16):
    D = Qh.shape[-1]
    q = Qh.astype(compute_dtype) * (1.0 / math.sqrt(D))
    logits = jnp.einsum("bhqd,bhkd->bhqk", q, Kh.astype(compute_dtype),
                        preferred_element_type=jnp.float32)
    if clip is not None:
        logits = clip * jnp.tanh(logits)
    if mask is not None:
        m = mask[:, :, 0][:, None, None, :]
        logits = jnp.where(m, jnp.float32(-inf), logits)
    return logits


if __name__ == "__main__":
    B, n_heads, embed_dim = 2, 8, 128          # head_depth = 16 (module default)
    n_nodes = 11                               # not a multiple of 8/128 -> no pads needed

    key = jax.random.PRNGKey(0)
    kx, kq, km, kp = jax.random.split(key, 4)
    x = jax.random.normal(kx, (B, n_nodes, embed_dim), jnp.float32)
    q_single = jax.random.normal(kq, (B, 1, embed_dim), jnp.float32)
    mask = jax.random.uniform(km, (B, n_nodes, 1)) > 0.6
    mask = mask.at[:, 0, :].set(False)         # keep >= 1 visible key per row

    params = init_mha_params(kp, n_heads, embed_dim)

    # Tolerances account for the approximate softmax reciprocal (EUP) and
    # minor bf16 rounding-order differences vs the precision-matched reference.
    TOL = 2e-2

    # 1) encoder-style self-attention with projections (need_W=True)
    out = multi_head_attention([x, x, x], mask, n_heads=n_heads,
                               embed_dim=embed_dim, need_W=True, params=params)
    out = jax.block_until_ready(out)
    ref = _mha_reference([x, x, x], mask, params, n_heads, embed_dim, need_W=True)
    assert out.shape == (B, n_nodes, embed_dim)
    err = float(jnp.max(jnp.abs(out - ref)))
    assert err < TOL, f"MHA(need_W) mismatch, max abs err {err}"

    # 2) decoder-style single-query glimpse (q_seq=1), no projections
    out1 = multi_head_attention([q_single, x, x], mask, n_heads=n_heads,
                                embed_dim=embed_dim, need_W=False)
    out1 = jax.block_until_ready(out1)
    ref1 = _mha_reference([q_single, x, x], mask, None, n_heads, embed_dim,
                          need_W=False)
    assert out1.shape == (B, 1, embed_dim)
    err1 = float(jnp.max(jnp.abs(out1 - ref1)))
    assert err1 < TOL, f"MHA(no W) mismatch, max abs err {err1}"

    # 3) clipped pointer logits (single head, clip*tanh, return_logits=True)
    Qh = _split_heads(q_single, 1)             # (B, 1, 1, embed_dim)
    Kh = _split_heads(x, 1)                    # (B, 1, n_nodes, embed_dim)
    logits = dot_product_attention(Qh, Kh, Kh, mask, clip=10.0, return_logits=True)
    logits = jax.block_until_ready(logits)
    logits_ref = _logits_reference(Qh, Kh, mask, clip=10.0)
    assert logits.shape == (B, 1, 1, n_nodes)
    errl = float(jnp.max(jnp.abs(logits - logits_ref)))
    assert errl < 5e-2, f"logits mismatch, max abs err {errl}"

    print("KERNEL_OK")
</pallas_src>

<mosaic_0001>
module attributes {stable_mosaic.version = 11 : i64} {
  func.func @kernel(%arg0: i32, %arg1: memref<1x8x11x16xbf16, #tpu.memory_space<vmem>>, %arg2: memref<1x8x16x11xbf16, #tpu.memory_space<vmem>>, %arg3: memref<1x8x11x16xbf16, #tpu.memory_space<vmem>>, %arg4: memref<1x1x11xf32, #tpu.memory_space<vmem>>, %arg5: memref<1x11x128xf32, #tpu.memory_space<vmem>>) attributes {dimension_semantics = [#tpu.dimension_semantics<parallel>], iteration_bounds = array<i64: 2>, scalar_prefetch = 0 : i64, scratch_operands = 0 : i64, tpu.core_type = #tpu.core_type<tc>, window_params = [{transform_indices = @transform_0, window_bounds = array<i64: 1, 8, 11, 16>}, {transform_indices = @transform_1, window_bounds = array<i64: 1, 8, 16, 11>}, {transform_indices = @transform_2, window_bounds = array<i64: 1, 8, 11, 16>}, {transform_indices = @transform_3, window_bounds = array<i64: 1, 1, 11>}, {transform_indices = @transform_4, window_bounds = array<i64: 1, 11, 128>}]} {
    %c0 = arith.constant 0 : index
    %c0_0 = arith.constant 0 : index
    %c0_1 = arith.constant 0 : index
    %c0_2 = arith.constant 0 : index
    %0 = vector.load %arg1[%c0, %c0_0, %c0_1, %c0_2] : memref<1x8x11x16xbf16, #tpu.memory_space<vmem>>, vector<1x8x11x16xbf16>
    %1 = vector.shape_cast %0 : vector<1x8x11x16xbf16> to vector<8x11x16xbf16>
    %cst = arith.constant 2.500000e-01 : bf16
    %2 = vector.broadcast %cst : bf16 to vector<8x11x16xbf16>
    %3 = arith.mulf %1, %2 : vector<8x11x16xbf16>
    %c0_3 = arith.constant 0 : index
    %c0_4 = arith.constant 0 : index
    %c0_5 = arith.constant 0 : index
    %c0_6 = arith.constant 0 : index
    %4 = vector.load %arg2[%c0_3, %c0_4, %c0_5, %c0_6] : memref<1x8x16x11xbf16, #tpu.memory_space<vmem>>, vector<1x8x16x11xbf16>
    %5 = vector.shape_cast %4 : vector<1x8x16x11xbf16> to vector<8x16x11xbf16>
    %c0_7 = arith.constant 0 : index
    %c0_8 = arith.constant 0 : index
    %c0_9 = arith.constant 0 : index
    %c0_10 = arith.constant 0 : index
    %6 = vector.load %arg3[%c0_7, %c0_8, %c0_9, %c0_10] : memref<1x8x11x16xbf16, #tpu.memory_space<vmem>>, vector<1x8x11x16xbf16>
    %7 = vector.shape_cast %6 : vector<1x8x11x16xbf16> to vector<8x11x16xbf16>
    "tpu.trace_start"() <{level = 10 : i32, message = "gqd,gdk->gqk"}> : () -> ()
    %cst_11 = arith.constant dense<0.000000e+00> : vector<8x11x11xf32>
    %8 = tpu.matmul %3, %5, %cst_11 {dimension_numbers = #tpu.dot_dimension_numbers<[2], [1], [1], [2], [0, 0, 0, 1, 1, 2], [0], [0]>} : vector<8x11x16xbf16>, vector<8x16x11xbf16>, vector<8x11x11xf32> -> vector<8x11x11xf32>
    "tpu.trace_stop"() : () -> ()
    %c0_12 = arith.constant 0 : index
    %c0_13 = arith.constant 0 : index
    %c0_14 = arith.constant 0 : index
    %9 = vector.load %arg4[%c0_12, %c0_13, %c0_14] : memref<1x1x11xf32, #tpu.memory_space<vmem>>, vector<1x1x11xf32>
    %10 = vector.shape_cast %9 : vector<1x1x11xf32> to vector<1x1x1x11xf32>
    %11 = vector.shape_cast %10 : vector<1x1x1x11xf32> to vector<1x1x1x11xf32>
    %12 = vector.broadcast %11 : vector<1x1x1x11xf32> to vector<1x8x1x11xf32>
    %13 = vector.shape_cast %12 : vector<1x8x1x11xf32> to vector<8x1x11xf32>
    %cst_15 = arith.constant 0.000000e+00 : f32
    %14 = vector.broadcast %cst_15 : f32 to vector<8x1x11xf32>
    %15 = arith.cmpf olt, %13, %14 : vector<8x1x11xf32>
    %16 = vector.shape_cast %15 : vector<8x1x11xi1> to vector<8x1x11xi1>
    %17 = vector.broadcast %16 : vector<8x1x11xi1> to vector<8x11x11xi1>
    %18 = vector.shape_cast %13 : vector<8x1x11xf32> to vector<8x1x11xf32>
    %19 = vector.broadcast %18 : vector<8x1x11xf32> to vector<8x11x11xf32>
    %20 = arith.select %17, %19, %8 : vector<8x11x11xi1>, vector<8x11x11xf32>
    %cst_16 = arith.constant dense<0xFF800000> : vector<8x11xf32>
    %21 = vector.multi_reduction <maximumf>, %20, %cst_16 [2] : vector<8x11x11xf32> to vector<8x11xf32>
    %22 = vector.shape_cast %21 : vector<8x11xf32> to vector<8x11x1xf32>
    %23 = vector.broadcast %22 : vector<8x11x1xf32> to vector<8x11x11xf32>
    %24 = arith.subf %20, %23 : vector<8x11x11xf32>
    %25 = math.exp %24 : vector<8x11x11xf32>
    %cst_17 = arith.constant dense<0.000000e+00> : vector<8x11xf32>
    %26 = vector.multi_reduction <add>, %25, %cst_17 [2] : vector<8x11x11xf32> to vector<8x11xf32>
    %27 = vector.shape_cast %26 : vector<8x11xf32> to vector<8x11x1xf32>
    %28 = tpu.reciprocal %27 {approx = true} : vector<8x11x1xf32> -> vector<8x11x1xf32>
    %29 = vector.broadcast %28 : vector<8x11x1xf32> to vector<8x11x11xf32>
    %30 = arith.mulf %25, %29 : vector<8x11x11xf32>
    %31 = arith.truncf %30 : vector<8x11x11xf32> to vector<8x11x11xbf16>
    "tpu.trace_start"() <{level = 10 : i32, message = "gqk,gkd->gqd"}> : () -> ()
    %cst_18 = arith.constant dense<0.000000e+00> : vector<8x11x16xf32>
    %32 = tpu.matmul %31, %7, %cst_18 {dimension_numbers = #tpu.dot_dimension_numbers<[2], [1], [1], [2], [0, 0, 0, 1, 1, 2], [0], [0]>} : vector<8x11x11xbf16>, vector<8x11x16xbf16>, vector<8x11x16xf32> -> vector<8x11x16xf32>
    "tpu.trace_stop"() : () -> ()
    %33 = vector.shape_cast %32 : vector<8x11x16xf32> to vector<1x8x11x16xf32>
    %34 = tpu.transpose %33, [0, 2, 1, 3] : vector<1x8x11x16xf32> -> vector<1x11x8x16xf32>
    %35 = vector.shape_cast %34 : vector<1x11x8x16xf32> to vector<1x11x128xf32>
    %c0_19 = arith.constant 0 : index
    %c0_20 = arith.constant 0 : index
    %c0_21 = arith.constant 0 : index
    %36 = vector.load %arg5[%c0_19, %c0_20, %c0_21] : memref<1x11x128xf32, #tpu.memory_space<vmem>>, vector<1x11x128xf32>
    tpu.vector_store %arg5[%c0_19, %c0_20, %c0_21], %35 {strides = array<i32>} : memref<1x11x128xf32, #tpu.memory_space<vmem>>, vector<1x11x128xf32>,
    return
  }
  func.func @transform_0(%arg0: i32) -> (i32, i32, i32, i32) {
    %c0_i32 = arith.constant 0 : i32
    %c0_i32_0 = arith.constant 0 : i32
    %c0_i32_1 = arith.constant 0 : i32
    %c0_i32_2 = arith.constant 0 : i32
    return %arg0, %c0_i32, %c0_i32_0, %c0_i32_1 : i32, i32, i32, i32
  }
  func.func @transform_1(%arg0: i32) -> (i32, i32, i32, i32) {
    %c0_i32 = arith.constant 0 : i32
    %c0_i32_0 = arith.constant 0 : i32
    %c0_i32_1 = arith.constant 0 : i32
    %c0_i32_2 = arith.constant 0 : i32
    return %arg0, %c0_i32, %c0_i32_0, %c0_i32_1 : i32, i32, i32, i32
  }
  func.func @transform_2(%arg0: i32) -> (i32, i32, i32, i32) {
    %c0_i32 = arith.constant 0 : i32
    %c0_i32_0 = arith.constant 0 : i32
    %c0_i32_1 = arith.constant 0 : i32
    %c0_i32_2 = arith.constant 0 : i32
    return %arg0, %c0_i32, %c0_i32_0, %c0_i32_1 : i32, i32, i32, i32
  }
  func.func @transform_3(%arg0: i32) -> (i32, i32, i32) {
    %c0_i32 = arith.constant 0 : i32
    %c0_i32_0 = arith.constant 0 : i32
    %c0_i32_1 = arith.constant 0 : i32
    return %arg0, %c0_i32, %c0_i32_0 : i32, i32, i32
  }
  func.func @transform_4(%arg0: i32) -> (i32, i32, i32) {
    %c0_i32 = arith.constant 0 : i32
    %c0_i32_0 = arith.constant 0 : i32
    %c0_i32_1 = arith.constant 0 : i32
    return %arg0, %c0_i32, %c0_i32_0 : i32, i32, i32
  }
}

</mosaic_0001>

<bundles_post_ra>
// kernel: tpu_custom_call.1
= control target key start
LH: loop header
LB: loop body
LE: loop exit
PB: predicated region body
PF: predicated region fallthrough
CT: control target
= control target key end

     0   :  { %s1778_s15 = smov 0   ;;  %s2247_s0 = inlined_call_operand.vmem [shape: bf16[2,8,11,16], index: 0, kind: input, shape index: {}]   ;;  %s2248_s1 = inlined_call_operand.vmem [shape: bf16[2,8,16,11], index: 1, kind: input, shape index: {}]   ;;  %s2249_s2 = inlined_call_operand.vmem [shape: bf16[2,8,11,16], index: 2, kind: input, shape index: {}]   ;;  %s2250_s3 = inlined_call_operand.vmem [shape: f32[2,1,11], index: 3, kind: input, shape index: {}]   ;;  %s2251_s4 = inlined_call_operand.vmem [shape: f32[2,11,128], index: 4, kind: output, shape index: {}]  }
   0x1 LB: > { %s1535_s16 = sadd.s32 4294967295, %s1740_s15   ;;  %p1539_p0 = scmp.ge.s32.totalorder %s1740_s15, 1  ;;  %s1740_s15 = sphi %s1778_s15, %s14_s15  }
   0x2   : > { %p190_p1 = scmp.lt.s32.totalorder %s1740_s15, 3 }
   0x4   : > { %p191_p2 = pnand %p1539_p0, %p190_p1 }
   0x5   : > { %p229_p3 = scmp.lt.s32.totalorder (!%p191_p2), %s1535_s16, 1  ;;  %s1746_s30 = smov (!%p191_p2), 16  }
   0x6   : > { %194 = sbr.rel (%p191_p2) target bundleno = 780 (0x30c), region = 36  ;;  %s1747_s5 = smov (!%p191_p2), 96  }
   0x7   : > { %s1748_s6 = smov (!%p191_p2), 64   ;;  %s1749_s7 = smov (!%p191_p2), 80  }
   0x8   : > { %s1750_s8 = smov (!%p191_p2), 48   ;;  %s1751_s9 = smov (!%p191_p2), 32  }
   0x9   : > { %s1752_s10 = smov (!%p191_p2), 112  }
   0xb   : > { %s2255_s16 = smov (!%p229_p3, %s1535_s16), 1  ;;  %vm360_vm0 = vcmask 130048   ;;  %vm598_vm3 = vcmask 89088   ;;  %vm602_vm4 = vcmask 83968   ;;  %vm805_vm5 = vcmask 1044480  }
   0xc   : > { %s1789_s17 = sshll.u32 %s2255_s16, 6  ;;  %s246_s26 = scalar_lea.vmem %s2250_s3, %s2255_s16  ;;  %vm806_vm6 = vcmask 1045504   ;;  %vm1037_vm7 = vcmask 1047556   ;;  %vm1427_vm8 = vcmask 261120   ;;  %vm1430_vm9 = vcmask 392192  }
   0xd   : > { %s1795_s20 = scalar_lea.vmem %s2247_s0, %s1789_s17  ;;  %s1801_s23 = scalar_lea.vmem %s2248_s1, %s1789_s17  ;;  %vm1433_vm10 = vcmask 523264   ;;  %vm1436_vm11 = vcmask 654336   ;;  %vm1439_vm12 = vcmask 785408   ;;  %vm1442_vm13 = vcmask 916480  }
   0xe   : > { %v1634_v0 = vld [vmem:[%s1801_s23] sm:$0xff]  ;;  %v1636_v1 = vld [vmem:[%s1801_s23 + $0x10] sm:$0xff]  ;;  %v1637_v2 = vld [vmem:[%s1801_s23 + $0x18] sm:$0xff]  ;;  %s2041_s29 = scalar_lea.vmem %s2249_s2, %s1789_s17  ;;  %s1633_s11 = sshll.u32 %s2255_s16, 4 }
   0xf   : > { %v253_v3 = vld [vmem:[%s1795_s20] sm:$0xf]  ;;  %v254_v4 = vld [vmem:[%s1795_s20 + $0x4] sm:$0x3]  ;;  %v257_v5 = vld [vmem:[%s1795_s20 + $0x10] sm:$0xf]  ;;  %371 = vmatpush.bf16.msra.mxu0 %v1634_v0  ;;  %427 = vmatpush.bf16.msra.mxu2 %v1636_v1  ;;  %s251_s14 = scalar_lea.vmem %s2251_s4, %s1633_s11 }
  0x10   : > { %v269_v6 = vunpack.c.l.bf16 %v253_v3  ;;  %v270_v7 = vunpack.c.l.bf16 %v254_v4  ;;  %v258_v8 = vld [vmem:[%s1795_s20 + $0x14] sm:$0x3]  ;;  %v273_v9 = vunpack.c.l.bf16 %v257_v5  ;;  %v259_v10 = vld [vmem:[%s1795_s20 + $0x18] sm:$0xf]  ;;  %v260_v11 = vld [vmem:[%s1795_s20 + $0x1c] sm:$0x3]  ;;  %455 = vmatpush.bf16.msra.mxu3 %v1637_v2 }
  0x11   : > { %v274_v12 = vunpack.c.l.bf16 %v258_v8  ;;  %v275_v13 = vunpack.c.l.bf16 %v259_v10  ;;  %v276_v14 = vunpack.c.l.bf16 %v260_v11  ;;  %v1635_v15 = vld [vmem:[%s1801_s23 + $0x8] sm:$0xff]  ;;  %v1640_v16 = vld [vmem:[%s1801_s23 + $0x30] sm:$0xff]  ;;  %v1641_v17 = vld [vmem:[%s1801_s23 + $0x38] sm:$0xff] }
  0x12   : > { %v285_v18 = vmul.f32 0.25, %v269_v6  ;;  %v286_v19 = vmul.f32 0.25, %v270_v7  ;;  %v289_v20 = vmul.f32 0.25, %v273_v9  ;;  %v255_v21 = vld [vmem:[%s1795_s20 + $0x8] sm:$0xf]  ;;  %v1638_v22 = vld [vmem:[%s1801_s23 + $0x20] sm:$0xff]  ;;  %399 = vmatpush.bf16.msra.mxu1 %v1635_v15 }
  0x13   : > { %v290_v23 = vmul.f32 0.25, %v274_v12  ;;  %v291_v24 = vmul.f32 0.25, %v275_v13  ;;  %v292_v25 = vmul.f32 0.25, %v276_v14  ;;  %539 = vmatpush.bf16.msrb.mxu2 %v1640_v16  ;;  %v256_v26 = vld [vmem:[%s1795_s20 + $0xc] sm:$0x3]  ;;  %v271_v27 = vunpack.c.l.bf16 %v255_v21  ;;  %483 = vmatpush.bf16.msrb.mxu0 %v1638_v22 }
  0x14   : > { %v1639_v28 = vld [vmem:[%s1801_s23 + $0x28] sm:$0xff]  ;;  %v301_v29 = vpack.c.bf16 %v285_v18, %v285_v18  ;;  %v302_v30 = vpack.c.bf16 %v286_v19, %v286_v19  ;;  %v305_v31 = vpack.c.bf16 %v289_v20, %v289_v20  ;;  %567 = vmatpush.bf16.msrb.mxu3 %v1641_v17  ;;  %v272_v32 = vunpack.c.l.bf16 %v256_v26  ;;  %v265_v37 = vld [vmem:[%s1795_s20 + $0x30] sm:$0xf]  ;;  %v266_v38 = vld [vmem:[%s1795_s20 + $0x34] sm:$0x3] }
  0x15   : > { %v306_v33 = vpack.c.bf16 %v290_v23, %v290_v23  ;;  %v307_v34 = vpack.c.bf16 %v291_v24, %v291_v24  ;;  %v308_v35 = vpack.c.bf16 %v292_v25, %v292_v25  ;;  %v287_v36 = vmul.f32 0.25, %v271_v27  ;;  %v267_v43 = vld [vmem:[%s1795_s20 + $0x38] sm:$0xf]  ;;  %v268_v48 = vld [vmem:[%s1795_s20 + $0x3c] sm:$0x3] }
  0x16   : > { %511 = vmatpush.bf16.msrb.mxu1 %v1639_v28  ;;  %v351_v39 = vunpack.c.l.b16 %v301_v29  ;;  %v352_v40 = vunpack.c.l.b16 %v302_v30  ;;  %v408_v41 = vunpack.c.l.b16 %v305_v31  ;;  %v288_v42 = vmul.f32 0.25, %v272_v32  ;;  %v261_v53 = vld [vmem:[%s1795_s20 + $0x20] sm:$0xf]  ;;  %v262_v54 = vld [vmem:[%s1795_s20 + $0x24] sm:$0x3] }
  0x17   : > { %v409_v44 = vunpack.c.l.b16 %v306_v33  ;;  %v436_v45 = vunpack.c.l.b16 %v307_v34  ;;  %v437_v46 = vunpack.c.l.b16 %v308_v35  ;;  %v303_v47 = vpack.c.bf16 %v287_v36, %v287_v36  ;;  %v263_v55 = vld [vmem:[%s1795_s20 + $0x28] sm:$0xf]  ;;  %v264_v0 = vld [vmem:[%s1795_s20 + $0x2c] sm:$0x3]  ;;  %v574_v32 = vld [vmem:[%s246_s26] sm:$0x1] }
  0x18   : > { %v353_v49 = vpack.c.b16 %v352_v40, %v351_v39  ;;  %v304_v50 = vpack.c.bf16 %v288_v42, %v288_v42  ;;  %v281_v51 = vunpack.c.l.bf16 %v265_v37  ;;  %v282_v52 = vunpack.c.l.bf16 %v266_v38  ;;  %v1839_v36 = vld [vmem:[%s246_s26] ss:$0 sm:$0xff] }
  0x19   : > { %v410_v56 = vpack.c.b16 %v409_v44, %v408_v41  ;;  %v438_v57 = vpack.c.b16 %v437_v46, %v436_v45  ;;  %v380_v58 = vunpack.c.l.b16 %v303_v47  ;;  %v283_v59 = vunpack.c.l.bf16 %v267_v43 }
  0x1a   : > { %1552 = vmatmul.msk.bf16.vlgmr.msra.gmra.mxu0 %vm360_vm0, %v353_v49  ;;  %v381_v60 = vunpack.c.l.b16 %v304_v50  ;;  %v297_v61 = vmul.f32 0.25, %v281_v51  ;;  %v298_v62 = vmul.f32 0.25, %v282_v52  ;;  %v284_v63 = vunpack.c.l.bf16 %v268_v48 }
  0x1b   : > { %1562 = vmatmul.msk.bf16.vlgmr.msra.gmra.mxu2 %vm360_vm0, %v410_v56  ;;  %1567 = vmatmul.msk.bf16.vlgmr.msra.gmra.mxu3 %vm360_vm0, %v438_v57  ;;  %v299_v1 = vmul.f32 0.25, %v283_v59  ;;  %v277_v2 = vunpack.c.l.bf16 %v261_v53  ;;  %v278_v3 = vunpack.c.l.bf16 %v262_v54  ;;  %v279_v4 = vunpack.c.l.bf16 %v263_v55 }
  0x1c   : > { %v382_v5 = vpack.c.b16 %v381_v60, %v380_v58  ;;  %v300_v6 = vmul.f32 0.25, %v284_v63  ;;  %v280_v9 = vunpack.c.l.bf16 %v264_v0  ;;  %v313_v10 = vpack.c.bf16 %v297_v61, %v297_v61 }
  0x1d   : > { %v293_v7 = vmul.f32 0.25, %v277_v2  ;;  %v294_v8 = vmul.f32 0.25, %v278_v3  ;;  %v314_v11 = vpack.c.bf16 %v298_v62, %v298_v62  ;;  %v315_v12 = vpack.c.bf16 %v299_v1, %v299_v1 }
  0x1e   : > { %1557 = vmatmul.msk.bf16.vlgmr.msra.gmra.mxu1 %vm360_vm0, %v382_v5  ;;  %v295_v13 = vmul.f32 0.25, %v279_v4  ;;  %v316_v14 = vpack.c.bf16 %v300_v6, %v300_v6  ;;  %v296_v17 = vmul.f32 0.25, %v280_v9  ;;  %v520_v22 = vunpack.c.l.b16 %v313_v10 }
  0x1f   : > { %v309_v15 = vpack.c.bf16 %v293_v7, %v293_v7  ;;  %v310_v16 = vpack.c.bf16 %v294_v8, %v294_v8  ;;  %v521_v23 = vunpack.c.l.b16 %v314_v11  ;;  %v548_v24 = vunpack.c.l.b16 %v315_v12 }
  0x20   : > { %v311_v20 = vpack.c.bf16 %v295_v13, %v295_v13  ;;  %v312_v21 = vpack.c.bf16 %v296_v17, %v296_v17  ;;  %v549_v25 = vunpack.c.l.b16 %v316_v14  ;;  %vm575_vm1 = vcmp.lt.f32.partialorder %v574_v32, 0.0 }
  0x21   : > { %v464_v18 = vunpack.c.l.b16 %v309_v15  ;;  %v465_v19 = vunpack.c.l.b16 %v310_v16  ;;  %v522_v29 = vpack.c.b16 %v521_v23, %v520_v22  ;;  %v1742_v33 = vmov 0  }
  0x22   : > { %v492_v27 = vunpack.c.l.b16 %v311_v20  ;;  %v493_v28 = vunpack.c.l.b16 %v312_v21  ;;  %v550_v30 = vpack.c.b16 %v549_v25, %v548_v24  ;;  %v576_v34 = vsel %vm575_vm1, 1, %v1742_v33 }
  0x23   : > { %v466_v26 = vpack.c.b16 %v465_v19, %v464_v18  ;;  %v577_v35 = vperm.slane %v576_v34, 0 }
  0x24   : > { %v494_v31 = vpack.c.b16 %v493_v28, %v492_v27 }
  0x25   : > { %vm1841_vm2 = vcmp.eq.s32.totalorder %v577_v35, 1 }
  0x2a   : > { %1572 = vmatmul.msk.bf16.vlgmr.msrb.gmra.mxu0 %vm360_vm0, %v466_v26 }
  0x2b   : > { %1582 = vmatmul.msk.bf16.vlgmr.msrb.gmra.mxu2 %vm360_vm0, %v522_v29  ;;  %1587 = vmatmul.msk.bf16.vlgmr.msrb.gmra.mxu3 %vm360_vm0, %v550_v30 }
  0x2e   : > { %1577 = vmatmul.msk.bf16.vlgmr.msrb.gmra.mxu1 %vm360_vm0, %v494_v31 }
  0x97   : > { %v373_v38 = vpop.f32.mrf.mxu0 }
  0x98   : > { %v1848_v39 = vsel %vm1841_vm2, %v1839_v36, %v373_v38 }
  0x99   : > { %v599_v40 = vsel %vm598_vm3, %v1848_v39, -inf }
  0x9a   : > { %600 = vmax.xlane.f32.xlu2 %v599_v40 }
  0x9b   : > { %v401_v41 = vpop.f32.mrf.mxu1 }
  0x9c   : > { %v1890_v58 = vsel %vm1841_vm2, %v1839_v36, %v401_v41 }
  0x9d   : > { %v606_v63 = vsel %vm598_vm3, %v1890_v58, -inf }
  0x9e   : > { %v429_v42 = vpop.f32.mrf.mxu2  ;;  %v457_v43 = vpop.f32.mrf.mxu3 }
  0x9f   : > { %v375_v44 = vpop.f32.mrf.mxu0  ;;  %v1855_v45 = vsel %vm1841_vm2, %v1839_v36, %v457_v43  ;;  %v1860_v46 = vsel %vm1841_vm2, %v1839_v36, %v429_v42 }
  0xa0   : > { %v618_v47 = vsel %vm598_vm3, %v1855_v45, -inf  ;;  %v612_v48 = vsel %vm598_vm3, %v1860_v46, -inf  ;;  %v1869_v49 = vsel %vm1841_vm2, %v1839_v36, %v375_v44 }
  0xa1   : > { %619 = vmax.xlane.f32.xlu1 %v618_v47  ;;  %613 = vmax.xlane.f32.xlu0 %v612_v48  ;;  %v603_v50 = vsel %vm602_vm4, %v1869_v49, -inf }
  0xa2   : > { %604 = vmax.xlane.f32.xlu2 %v603_v50 }
  0xa3   : > { %v403_v57 = vpop.f32.mrf.mxu1 }
  0xa4   : > { %v1895_v59 = vsel %vm1841_vm2, %v1839_v36, %v403_v57 }
  0xa5   : > { %v609_v0 = vsel %vm602_vm4, %v1895_v59, -inf }
  0xa6   : > { %v431_v51 = vpop.f32.mrf.mxu2  ;;  %v459_v52 = vpop.f32.mrf.mxu3 }
  0xa7   : > { %v1876_v53 = vsel %vm1841_vm2, %v1839_v36, %v459_v52  ;;  %v1881_v54 = vsel %vm1841_vm2, %v1839_v36, %v431_v51  ;;  %v485_v60 = vpop.f32.mrf.mxu0 }
  0xa8   : > { %v621_v55 = vsel %vm602_vm4, %v1876_v53, -inf  ;;  %v615_v56 = vsel %vm602_vm4, %v1881_v54, -inf  ;;  %v1932_v13 = vsel %vm1841_vm2, %v1839_v36, %v485_v60 }
  0xa9   : > { %622 = vmax.xlane.f32.xlu1 %v621_v55  ;;  %616 = vmax.xlane.f32.xlu0 %v615_v56  ;;  %v624_v16 = vsel %vm598_vm3, %v1932_v13, -inf }
  0xab   : > { %v513_v4 = vpop.f32.mrf.mxu1 }
  0xac   : > { %v1942_v15 = vsel %vm1841_vm2, %v1839_v36, %v513_v4 }
  0xad   : > { %v630_v18 = vsel %vm598_vm3, %v1942_v15, -inf }
  0xae   : > { %v541_v61 = vpop.f32.mrf.mxu2  ;;  %v569_v62 = vpop.f32.mrf.mxu3 }
  0xaf   : > { %v1904_v1 = vsel %vm1841_vm2, %v1839_v36, %v541_v61  ;;  %v1911_v3 = vsel %vm1841_vm2, %v1839_v36, %v569_v62  ;;  %v487_v12 = vpop.f32.mrf.mxu0 }
  0xb0   : > { %v636_v2 = vsel %vm598_vm3, %v1904_v1, -inf  ;;  %v642_v7 = vsel %vm598_vm3, %v1911_v3, -inf  ;;  %v1937_v14 = vsel %vm1841_vm2, %v1839_v36, %v487_v12 }
  0xb1   : > { %607 = vmax.xlane.f32.xlu0 %v606_v63  ;;  %610 = vmax.xlane.f32.xlu1 %v609_v0  ;;  %v627_v17 = vsel %vm602_vm4, %v1937_v14, -inf }
  0xb2   : > { %637 = vmax.xlane.f32.xlu2 %v636_v2 }
  0xb3   : > { %v515_v19 = vpop.f32.mrf.mxu1 }
  0xb4   : > { %v1953_v20 = vsel %vm1841_vm2, %v1839_v36, %v515_v19 }
  0xb5   : > { %v633_v21 = vsel %vm602_vm4, %v1953_v20, -inf }
  0xb6   : > { %v543_v5 = vpop.f32.mrf.mxu2  ;;  %v571_v6 = vpop.f32.mrf.mxu3 }
  0xb7   : > { %v1918_v8 = vsel %vm1841_vm2, %v1839_v36, %v543_v5  ;;  %v1923_v9 = vsel %vm1841_vm2, %v1839_v36, %v571_v6 }
  0xb8   : > { %v639_v10 = vsel %vm602_vm4, %v1918_v8, -inf  ;;  %v645_v11 = vsel %vm602_vm4, %v1923_v9, -inf }
  0xb9   : > { %640 = vmax.xlane.f32.xlu0 %v639_v10  ;;  %643 = vmax.xlane.f32.xlu1 %v642_v7 }
  0xba   : > { %646 = vmax.xlane.f32.xlu2 %v645_v11 }
  0xc1   : > { %625 = vmax.xlane.f32.xlu0 %v624_v16  ;;  %628 = vmax.xlane.f32.xlu1 %v627_v17 }
  0xc2   : > { %631 = vmax.xlane.f32.xlu2 %v630_v18 }
  0xc9   : > { %634 = vmax.xlane.f32.xlu0 %v633_v21 }
 0x10d   : > { %v601_v22 = vpop.xlane.xlu2 %600 }
 0x10e   : > { %v648_v23 = vsub.f32 %v1848_v39, %v601_v22 }
 0x110   : > { %v664_v24 = vmul.f32 1.442695, %v648_v23 }
 0x112   : > { %1670 = vpow2.f32 %v664_v24 }
 0x114   : > { %v620_v25 = vpop.xlane.xlu1 %619  ;;  %v614_v26 = vpop.xlane.xlu0 %613 }
 0x115   : > { %v654_v27 = vsub.f32 %v1855_v45, %v620_v25  ;;  %v605_v28 = vpop.xlane.xlu2 %604  ;;  %v652_v48 = vsub.f32 %v1860_v46, %v614_v26 }
 0x116   : > { %v649_v30 = vsub.f32 %v1869_v49, %v605_v28 }
 0x117   : > { %v676_v29 = vmul.f32 1.442695, %v654_v27  ;;  %v672_v56 = vmul.f32 1.442695, %v652_v48 }
 0x118   : > { %v1960_v31 = vpop.eup %1670  ;;  %v666_v33 = vmul.f32 1.442695, %v649_v30 }
 0x119   : > { %1672 = vpow2.f32 %v676_v29  ;;  %v696_v32 = vsel %vm598_vm3, %v1960_v31, 0.0 }
 0x11a   : > { %697 = vadd.xlane.f32.xlu2 %v696_v32  ;;  %1674 = vpow2.f32 %v666_v33 }
 0x11c   : > { %v623_v34 = vpop.xlane.xlu1 %622  ;;  %v617_v35 = vpop.xlane.xlu0 %616 }
 0x11d   : > { %v653_v36 = vsub.f32 %v1881_v54, %v617_v35  ;;  %v655_v61 = vsub.f32 %v1876_v53, %v623_v34 }
 0x11f   : > { %v1965_v37 = vpop.eup %1672  ;;  %v674_v38 = vmul.f32 1.442695, %v653_v36  ;;  %v678_v53 = vmul.f32 1.442695, %v655_v61 }
 0x120   : > { %v714_v39 = vsel %vm598_vm3, %v1965_v37, 0.0  ;;  %v1969_v42 = vpop.eup %1674 }
 0x121   : > { %715 = vadd.xlane.f32.xlu0 %v714_v39  ;;  %1676 = vpow2.f32 %v674_v38  ;;  %v699_v54 = vsel %vm602_vm4, %v1969_v42, 0.0 }
 0x124   : > { %v608_v40 = vpop.xlane.xlu0 %607  ;;  %v611_v41 = vpop.xlane.xlu1 %610 }
 0x125   : > { %v650_v43 = vsub.f32 %v1890_v58, %v608_v40  ;;  %v651_v44 = vsub.f32 %v1895_v59, %v611_v41  ;;  %v638_v45 = vpop.xlane.xlu2 %637  ;;  %v1642_v41 = vld [vmem:[%s2041_s29] sm:$0x30] }
 0x126   : > { %v660_v47 = vsub.f32 %v1904_v1, %v638_v45 }
 0x127   : > { %v668_v49 = vmul.f32 1.442695, %v650_v43  ;;  %v670_v50 = vmul.f32 1.442695, %v651_v44  ;;  %v1975_v51 = vpop.eup %1676  ;;  %v1743_v44 = vmov 65535  }
 0x128   : > { %v688_v52 = vmul.f32 1.442695, %v660_v47  ;;  %v711_v55 = vsel %vm602_vm4, %v1975_v51, 0.0  ;;  %v807_v45 = vsel %vm805_vm5, 4294967295, %v1743_v44 }
 0x129   : > { %1678 = vpow2.f32 %v668_v49  ;;  %700 = vadd.xlane.f32.xlu0 %v699_v54  ;;  %712 = vadd.xlane.f32.xlu2 %v711_v55  ;;  %v2045_v47 = vsel %vm806_vm6, %v807_v45, 0  ;;  %v1595_v49 = vld [vmem:[%s2041_s29 + $0x8] sm:$0xf] }
 0x12a   : > { %1680 = vpow2.f32 %v670_v50  ;;  %v1643_v50 = vld [vmem:[%s2041_s29 + $0x8] sm:$0x30] }
 0x12b   : > { %1682 = vpow2.f32 %v688_v52  ;;  %v1596_v52 = vor.u32 %v1643_v50, %v1595_v49  ;;  %v1615_v49 = vld [vmem:[%s2041_s29 + $0x28] sm:$0xf]  ;;  %v1647_v50 = vld [vmem:[%s2041_s29 + $0x28] sm:$0x30] }
 0x12c   : > { %v644_v57 = vpop.xlane.xlu1 %643  ;;  %1684 = vpow2.f32 %v672_v56  ;;  %v641_v0 = vpop.xlane.xlu0 %640 }
 0x12d   : > { %v662_v46 = vsub.f32 %v1911_v3, %v644_v57  ;;  %v647_v58 = vpop.xlane.xlu2 %646  ;;  %v661_v12 = vsub.f32 %v1918_v8, %v641_v0  ;;  %v840_v54 = vand.u32 %v1596_v52, %v2045_v47  ;;  %v1600_v57 = vld [vmem:[%s2041_s29 + $0x10] sm:$0xf] }
 0x12e   : > { %v663_v59 = vsub.f32 %v1923_v9, %v647_v58 }
 0x12f   : > { %v1983_v60 = vpop.eup %1678  ;;  %v692_v62 = vmul.f32 1.442695, %v662_v46  ;;  %v690_v8 = vmul.f32 1.442695, %v661_v12  ;;  %849 = vmatpush.bf16.msra.mxu1 %v840_v54  ;;  %v1644_v46 = vld [vmem:[%s2041_s29 + $0x10] sm:$0x30] }
 0x130   : > { %v1986_v63 = vpop.eup %1680  ;;  %v694_v1 = vmul.f32 1.442695, %v663_v59  ;;  %v702_v2 = vsel %vm598_vm3, %v1983_v60, 0.0  ;;  %v1601_v58 = vor.u32 %v1644_v46, %v1600_v57 }
 0x131   : > { %v1990_v4 = vpop.eup %1682  ;;  %v705_v3 = vsel %vm602_vm4, %v1986_v63, 0.0  ;;  %703 = vadd.xlane.f32.xlu1 %v702_v2  ;;  %1686 = vpow2.f32 %v692_v62  ;;  %v1645_v2 = vld [vmem:[%s2041_s29 + $0x18] sm:$0x30] }
 0x132   : > { %706 = vadd.xlane.f32.xlu2 %v705_v3  ;;  %v732_v5 = vsel %vm598_vm3, %v1990_v4, 0.0  ;;  %1688 = vpow2.f32 %v694_v1  ;;  %v1996_v7 = vpop.eup %1684  ;;  %v870_v59 = vand.u32 %v1601_v58, %v2045_v47  ;;  %v1605_v1 = vld [vmem:[%s2041_s29 + $0x18] sm:$0xf] }
 0x133   : > { %733 = vadd.xlane.f32.xlu0 %v732_v5  ;;  %1690 = vpow2.f32 %v678_v53  ;;  %v708_v19 = vsel %vm598_vm3, %v1996_v7, 0.0  ;;  %v1606_v5 = vor.u32 %v1645_v2, %v1605_v1 }
 0x134   : > { %v629_v6 = vpop.xlane.xlu1 %628  ;;  %879 = vmatpush.bf16.msra.mxu2 %v870_v59 }
 0x135   : > { %v632_v9 = vpop.xlane.xlu2 %631  ;;  %v657_v10 = vsub.f32 %v1937_v14, %v629_v6  ;;  %v626_v14 = vpop.xlane.xlu0 %625  ;;  %v900_v53 = vand.u32 %v1606_v5, %v2045_v47 }
 0x136   : > { %v658_v11 = vsub.f32 %v1942_v15, %v632_v9  ;;  %v656_v24 = vsub.f32 %v1932_v13, %v626_v14 }
 0x137   : > { %v682_v16 = vmul.f32 1.442695, %v657_v10  ;;  %v2001_v17 = vpop.eup %1686  ;;  %909 = vmatpush.bf16.msra.mxu3 %v900_v53 }
 0x138   : > { %v684_v18 = vmul.f32 1.442695, %v658_v11  ;;  %v2005_v21 = vpop.eup %1688  ;;  %v738_v22 = vsel %vm598_vm3, %v2001_v17, 0.0  ;;  %v680_v30 = vmul.f32 1.442695, %v656_v24 }
 0x139   : > { %709 = vadd.xlane.f32.xlu1 %v708_v19  ;;  %v741_v15 = vsel %vm602_vm4, %v2005_v21, 0.0  ;;  %v2011_v23 = vpop.eup %1690  ;;  %v1648_v19 = vld [vmem:[%s2041_s29 + $0x30] sm:$0x30] }
 0x13a   : > { %1692 = vpow2.f32 %v684_v18  ;;  %739 = vadd.xlane.f32.xlu2 %v738_v22  ;;  %v717_v26 = vsel %vm602_vm4, %v2011_v23, 0.0  ;;  %v1620_v18 = vld [vmem:[%s2041_s29 + $0x30] sm:$0xf] }
 0x13b   : > { %1694 = vpow2.f32 %v682_v16  ;;  %742 = vadd.xlane.f32.xlu0 %v741_v15  ;;  %v1621_v15 = vor.u32 %v1648_v19, %v1620_v18 }
 0x13c   : > { %1696 = vpow2.f32 %v690_v8 }
 0x13d   : > { %v635_v32 = vpop.xlane.xlu0 %634  ;;  %1698 = vpow2.f32 %v680_v30  ;;  %v990_v8 = vand.u32 %v1621_v15, %v2045_v47 }
 0x13e   : > { %v659_v33 = vsub.f32 %v1953_v20, %v635_v32  ;;  %v1590_v20 = vld [vmem:[%s2041_s29] sm:$0xf] }
 0x13f   : > { %v1591_v43 = vor.u32 %v1642_v41, %v1590_v20  ;;  %999 = vmatpush.bf16.msrb.mxu2 %v990_v8 }
 0x140   : > { %v2014_v25 = vpop.eup %1692  ;;  %v686_v35 = vmul.f32 1.442695, %v659_v33 }
 0x141   : > { %v2018_v27 = vpop.eup %1694  ;;  %v726_v28 = vsel %vm598_vm3, %v2014_v25, 0.0  ;;  %718 = vadd.xlane.f32.xlu1 %v717_v26  ;;  %v810_v48 = vand.u32 %v1591_v43, %v2045_v47  ;;  %v1646_v43 = vld [vmem:[%s2041_s29 + $0x20] sm:$0x30] }
 0x142   : > { %v723_v29 = vsel %vm602_vm4, %v2018_v27, 0.0  ;;  %v2024_v13 = vpop.eup %1696  ;;  %1700 = vpow2.f32 %v686_v35  ;;  %v1625_v35 = vld [vmem:[%s2041_s29 + $0x38] sm:$0xf] }
 0x143   : > { %727 = vadd.xlane.f32.xlu0 %v726_v28  ;;  %724 = vadd.xlane.f32.xlu2 %v723_v29  ;;  %v735_v34 = vsel %vm602_vm4, %v2024_v13, 0.0  ;;  %v2029_v36 = vpop.eup %1698 }
 0x144   : > { %v720_v38 = vsel %vm598_vm3, %v2029_v36, 0.0  ;;  %819 = vmatpush.bf16.msra.mxu0 %v810_v48 }
 0x148   : > { %v2033_v39 = vpop.eup %1700 }
 0x149   : > { %736 = vadd.xlane.f32.xlu1 %v735_v34  ;;  %v729_v40 = vsel %vm602_vm4, %v2033_v39, 0.0 }
 0x151   : > { %721 = vadd.xlane.f32.xlu1 %v720_v38  ;;  %v1649_v38 = vld [vmem:[%s2041_s29 + $0x38] sm:$0x30] }
 0x152   : > { %v1626_v41 = vor.u32 %v1649_v38, %v1625_v35 }
 0x159   : > { %730 = vadd.xlane.f32.xlu1 %v729_v40  ;;  %v1610_v40 = vld [vmem:[%s2041_s29 + $0x20] sm:$0xf] }
 0x15a   : > { %v1611_v45 = vor.u32 %v1646_v43, %v1610_v40 }
 0x18d   : > { %v698_v55 = vpop.xlane.xlu2 %697 }
 0x18e   : > { %1702 = vrcp.f32 %v698_v55  ;;  %v1616_v55 = vor.u32 %v1647_v50, %v1615_v49 }
 0x190   : > { %v960_v59 = vand.u32 %v1616_v55, %v2045_v47 }
 0x192   : > { %969 = vmatpush.bf16.msrb.mxu1 %v960_v59 }
 0x194   : > { %v716_v56 = vpop.xlane.xlu0 %715  ;;  %v1703_v62 = vpop.eup %1702 }
 0x195   : > { %v760_v3 = vmul.f32 %v1703_v62, %v1960_v31 }
 0x197   : > { %v776_v9 = vpack.c.bf16 %v760_v3, %v760_v3 }
 0x199   : > { %v794_v22 = vunpack.c.l.b16 %v776_v9 }
 0x19c   : > { %v701_v61 = vpop.xlane.xlu0 %700  ;;  %v713_v0 = vpop.xlane.xlu2 %712 }
 0x19d   : > { %1704 = vrcp.f32 %v701_v61 }
 0x1a3   : > { %v1705_v6 = vpop.eup %1704 }
 0x1a4   : > { %v761_v10 = vmul.f32 %v1705_v6, %v1969_v42  ;;  %v704_v11 = vpop.xlane.xlu1 %703 }
 0x1a5   : > { %v707_v12 = vpop.xlane.xlu2 %706  ;;  %1706 = vrcp.f32 %v704_v11 }
 0x1a6   : > { %v777_v16 = vpack.c.bf16 %v761_v10, %v761_v10  ;;  %1708 = vrcp.f32 %v707_v12  ;;  %v734_v34 = vpop.xlane.xlu0 %733 }
 0x1a7   : > { %1710 = vrcp.f32 %v713_v0 }
 0x1a8   : > { %v795_v14 = vunpack.c.l.b16 %v777_v16 }
 0x1aa   : > { %v796_v31 = vpack.c.b16 %v795_v14, %v794_v22 }
 0x1ab   : > { %v1707_v24 = vpop.eup %1706 }
 0x1ac   : > { %v1709_v42 = vpop.eup %1708  ;;  %v762_v26 = vmul.f32 %v1707_v24, %v1983_v60  ;;  %1592 = vmatmul.msk.bf16.vlgmr.msra.gmra.mxu0 %vm598_vm3, %v796_v31  ;;  %v710_v28 = vpop.xlane.xlu1 %709 }
 0x1ad   : > { %v1711_v29 = vpop.eup %1710  ;;  %v763_v30 = vmul.f32 %v1709_v42, %v1986_v63  ;;  %1712 = vrcp.f32 %v710_v28  ;;  %v740_v48 = vpop.xlane.xlu2 %739  ;;  %v1020_v63 = vand.u32 %v1626_v41, %v2045_v47 }
 0x1ae   : > { %v778_v32 = vpack.c.bf16 %v762_v26, %v762_v26  ;;  %1714 = vrcp.f32 %v716_v56  ;;  %v765_v60 = vmul.f32 %v1711_v29, %v1975_v51  ;;  %v930_v56 = vand.u32 %v1611_v45, %v2045_v47  ;;  %v743_v2 = vpop.xlane.xlu0 %742 }
 0x1af   : > { %v779_v33 = vpack.c.bf16 %v763_v30, %v763_v30  ;;  %1029 = vmatpush.bf16.msrb.mxu3 %v1020_v63 }
 0x1b0   : > { %v828_v20 = vunpack.c.l.b16 %v778_v32  ;;  %v781_v57 = vpack.c.bf16 %v765_v60, %v765_v60  ;;  %939 = vmatpush.bf16.msrb.mxu0 %v930_v56  ;;  %v1744_v56 = vmov 1983009808  }
 0x1b1   : > { %v829_v44 = vunpack.c.l.b16 %v779_v33 }
 0x1b2   : > { %v859_v0 = vunpack.c.l.b16 %v781_v57  ;;  %v1042_v57 = vunpack.c.l.s4 %v1744_v56 }
 0x1b3   : > { %v1713_v52 = vpop.eup %1712  ;;  %v830_v54 = vpack.c.b16 %v829_v44, %v828_v20 }
 0x1b4   : > { %v764_v46 = vmul.f32 %v1713_v52, %v1996_v7  ;;  %v719_v58 = vpop.xlane.xlu1 %718  ;;  %v1715_v51 = vpop.eup %1714 }
 0x1b5   : > { %1597 = vmatmul.msk.bf16.vlgmr.msra.gmra.mxu1 %vm598_vm3, %v830_v54  ;;  %1716 = vrcp.f32 %v719_v58  ;;  %v766_v62 = vmul.f32 %v1715_v51, %v1965_v37 }
 0x1b6   : > { %v780_v61 = vpack.c.bf16 %v764_v46, %v764_v46  ;;  %1718 = vrcp.f32 %v734_v34  ;;  %v725_v53 = vpop.xlane.xlu2 %724  ;;  %v728_v15 = vpop.xlane.xlu0 %727 }
 0x1b7   : > { %1720 = vrcp.f32 %v740_v48  ;;  %v782_v7 = vpack.c.bf16 %v766_v62, %v766_v62 }
 0x1b8   : > { %v858_v1 = vunpack.c.l.b16 %v780_v61  ;;  %1722 = vrcp.f32 %v743_v2 }
 0x1b9   : > { %v888_v11 = vunpack.c.l.b16 %v782_v7 }
 0x1ba   : > { %v860_v3 = vpack.c.b16 %v859_v0, %v858_v1  ;;  %v2093_v0 = vunpack.c.0.s8 %v1042_v57 }
 0x1bb   : > { %v1717_v5 = vpop.eup %1716 }
 0x1bc   : > { %v767_v6 = vmul.f32 %v1717_v5, %v2011_v23  ;;  %1602 = vmatmul.msk.bf16.vlgmr.msra.gmra.mxu2 %vm598_vm3, %v860_v3  ;;  %v737_v47 = vpop.xlane.xlu1 %736  ;;  %v1719_v9 = vpop.eup %1718 }
 0x1bd   : > { %1724 = vrcp.f32 %v737_v47  ;;  %v772_v37 = vmul.f32 %v1719_v9, %v1990_v4  ;;  %v1721_v16 = vpop.eup %1720 }
 0x1be   : > { %v783_v10 = vpack.c.bf16 %v767_v6, %v767_v6  ;;  %1726 = vrcp.f32 %v725_v53  ;;  %v1723_v18 = vpop.eup %1722  ;;  %v774_v24 = vmul.f32 %v1721_v16, %v2001_v17 }
 0x1bf   : > { %v788_v14 = vpack.c.bf16 %v772_v37, %v772_v37  ;;  %v775_v42 = vmul.f32 %v1723_v18, %v2005_v21 }
 0x1c0   : > { %v889_v12 = vunpack.c.l.b16 %v783_v10  ;;  %v790_v30 = vpack.c.bf16 %v774_v24, %v774_v24  ;;  %v1745_v10 = vmov 1934713408  }
 0x1c1   : > { %v978_v4 = vunpack.c.l.b16 %v788_v14  ;;  %v791_v32 = vpack.c.bf16 %v775_v42, %v775_v42 }
 0x1c2   : > { %v890_v19 = vpack.c.b16 %v889_v12, %v888_v11  ;;  %v1008_v17 = vunpack.c.l.b16 %v790_v30  ;;  %v1090_v11 = vunpack.c.l.s4 %v1745_v10 }
 0x1c3   : > { %v1725_v22 = vpop.eup %1724  ;;  %v1009_v21 = vunpack.c.l.b16 %v791_v32 }
 0x1c4   : > { %v773_v31 = vmul.f32 %v1725_v22, %v2024_v13  ;;  %1607 = vmatmul.msk.bf16.vlgmr.msra.gmra.mxu3 %vm598_vm3, %v890_v19  ;;  %v722_v23 = vpop.xlane.xlu1 %721  ;;  %v1727_v8 = vpop.eup %1726  ;;  %v2104_v42 = vunpack.c.0.s8 %v1090_v11 }
 0x1c5   : > { %1728 = vrcp.f32 %v722_v23  ;;  %v769_v28 = vmul.f32 %v1727_v8, %v2018_v27  ;;  %v1010_v43 = vpack.c.b16 %v1009_v21, %v1008_v17 }
 0x1c6   : > { %v789_v26 = vpack.c.bf16 %v773_v31, %v773_v31  ;;  %1730 = vrcp.f32 %v728_v15 }
 0x1c7   : > { %v785_v13 = vpack.c.bf16 %v769_v28, %v769_v28 }
 0x1c8   : > { %v979_v29 = vunpack.c.l.b16 %v789_v26 }
 0x1c9   : > { %v919_v41 = vunpack.c.l.b16 %v785_v13 }
 0x1ca   : > { %v980_v33 = vpack.c.b16 %v979_v29, %v978_v4 }
 0x1cb   : > { %v1729_v34 = vpop.eup %1728 }
 0x1cc   : > { %v768_v35 = vmul.f32 %v1729_v34, %v2029_v36  ;;  %1622 = vmatmul.msk.bf16.vlgmr.msrb.gmra.mxu2 %vm598_vm3, %v980_v33  ;;  %v731_v38 = vpop.xlane.xlu1 %730  ;;  %v1731_v40 = vpop.eup %1730 }
 0x1cd   : > { %1732 = vrcp.f32 %v731_v38  ;;  %v770_v20 = vmul.f32 %v1731_v40, %v2014_v25 }
 0x1ce   : > { %v784_v60 = vpack.c.bf16 %v768_v35, %v768_v35 }
 0x1cf   : > { %v786_v48 = vpack.c.bf16 %v770_v20, %v770_v20 }
 0x1d0   : > { %v918_v27 = vunpack.c.l.b16 %v784_v60 }
 0x1d1   : > { %v948_v49 = vunpack.c.l.b16 %v786_v48 }
 0x1d2   : > { %v920_v44 = vpack.c.b16 %v919_v41, %v918_v27 }
 0x1d3   : > { %v1733_v45 = vpop.eup %1732 }
 0x1d4   : > { %v771_v63 = vmul.f32 %v1733_v45, %v2033_v39  ;;  %1612 = vmatmul.msk.bf16.vlgmr.msrb.gmra.mxu0 %vm598_vm3, %v920_v44  ;;  %1627 = vmatmul.msk.bf16.vlgmr.msrb.gmra.mxu3 %vm598_vm3, %v1010_v43 }
 0x1d6   : > { %v787_v36 = vpack.c.bf16 %v771_v63, %v771_v63 }
 0x1d8   : > { %v949_v50 = vunpack.c.l.b16 %v787_v36 }
 0x1da   : > { %v950_v52 = vpack.c.b16 %v949_v50, %v948_v49 }
 0x1dc   : > { %1617 = vmatmul.msk.bf16.vlgmr.msrb.gmra.mxu1 %vm598_vm3, %v950_v52 }
 0x229   : > { %v821_v54 = vpop.f32.mrf.mxu0 }
 0x22a   : > { %v1039_v59 = vrot.slane %v821_v54, 4 }
 0x231   : > { %v823_v61 = vpop.f32.mrf.mxu0 }
 0x232   : > { %v851_v55 = vpop.f32.mrf.mxu1 }
 0x233   : > { %v1051_v62 = vrot.slane %v851_v55, 4 }
 0x23a   : > { %v853_v18 = vpop.f32.mrf.mxu1 }
 0x23f   : > { %v881_v25 = vpop.f32.mrf.mxu2 }
 0x240   : > { %v1036_v51 = vrot.slane %v881_v25, 4  ;;  %v1040_v1 = vsel %vm1037_vm7, %v881_v25, %v1039_v59 }
 0x241   : > { %v1048_v7 = vperm.slane %v1040_v1, %v2093_v0 }
 0x242   : > { %v1038_v3 = vsel %vm1037_vm7, %v1036_v51, %v821_v54 }
 0x243   : > { %v1044_v47 = vperm.slane %v1038_v3, %v2093_v0  ;;  %v1099_v14 = vrot.slane %v1048_v7, 4 }
 0x245   : > { %v1087_v8 = vrot.slane %v1044_v47, 4 }
 0x247   : > { %v883_v46 = vpop.f32.mrf.mxu2  ;;  %v911_v58 = vpop.f32.mrf.mxu3 }
 0x248   : > { %v1049_v39 = vrot.slane %v911_v58, 4  ;;  %v1052_v2 = vsel %vm1037_vm7, %v911_v58, %v1051_v62  ;;  %v1149_v53 = vrot.slane %v883_v46, 4 }
 0x249   : > { %v1060_v6 = vperm.slane %v1052_v2, %v2093_v0 }
 0x24a   : > { %v1050_v5 = vsel %vm1037_vm7, %v1049_v39, %v851_v55  ;;  %v1150_v15 = vsel %vm1037_vm7, %v1149_v53, %v823_v61 }
 0x24b   : > { %v1056_v9 = vperm.slane %v1050_v5, %v2093_v0  ;;  %v1097_v31 = vrot.slane %v1060_v6, 4  ;;  %v1100_v26 = vsel %vm1037_vm7, %v1060_v6, %v1099_v14  ;;  %v1154_v29 = vperm.slane %v1150_v15, %v2093_v0 }
 0x24c   : > { %v1108_v13 = vperm.slane %v1100_v26, %v2104_v42 }
 0x24d   : > { %v1085_v24 = vrot.slane %v1056_v9, 4  ;;  %v1088_v30 = vsel %vm1037_vm7, %v1056_v9, %v1087_v8  ;;  %v1098_v33 = vsel %vm1037_vm7, %v1097_v31, %v1048_v7  ;;  %v1175_v27 = vrot.slane %v1154_v29, 4 }
 0x24e   : > { %v1096_v21 = vperm.slane %v1088_v30, %v2104_v42  ;;  %v1104_v43 = vperm.slane %v1098_v33, %v2104_v42  ;;  %v1147_v56 = vrot.slane %v1108_v13, 4 }
 0x24f   : > { %v913_v37 = vpop.f32.mrf.mxu3  ;;  %v1001_v12 = vpop.f32.mrf.mxu2  ;;  %v1086_v34 = vsel %vm1037_vm7, %v1085_v24, %v1044_v47 }
 0x250   : > { %v1155_v16 = vrot.slane %v913_v37, 4  ;;  %v1061_v19 = vrot.slane %v1001_v12, 4  ;;  %v1092_v48 = vperm.slane %v1086_v34, %v2104_v42  ;;  %v1139_v55 = vrot.slane %v1096_v21, 4 }
 0x251   : > { %v941_v22 = vpop.f32.mrf.mxu0  ;;  %v1143_v62 = vrot.slane %v1104_v43, 4 }
 0x252   : > { %v1063_v23 = vrot.slane %v941_v22, 4  ;;  %v1156_v4 = vsel %vm1037_vm7, %v1155_v16, %v853_v18  ;;  %v1062_v28 = vsel %vm1037_vm7, %v1061_v19, %v941_v22  ;;  %v1135_v61 = vrot.slane %v1092_v48, 4 }
 0x253   : > { %v1160_v35 = vperm.slane %v1156_v4, %v2093_v0  ;;  %v1068_v38 = vperm.slane %v1062_v28, %v2093_v0 }
 0x254   : > { %v1064_v32 = vsel %vm1037_vm7, %v1001_v12, %v1063_v23 }
 0x255   : > { %v1072_v60 = vperm.slane %v1064_v32, %v2093_v0  ;;  %v1173_v50 = vrot.slane %v1160_v35, 4  ;;  %v2124_v52 = vsel %vm1037_vm7, %v1160_v35, %v1175_v27  ;;  %v1111_v54 = vrot.slane %v1068_v38, 4 }
 0x256   : > { %v1184_v1 = vperm.slane %v2124_v52, %v2104_v42 }
 0x257   : > { %v1003_v40 = vpop.f32.mrf.mxu2  ;;  %v1031_v17 = vpop.f32.mrf.mxu3  ;;  %v1123_v57 = vrot.slane %v1072_v60, 4  ;;  %v1174_v3 = vsel %vm1037_vm7, %v1173_v50, %v1154_v29 }
 0x258   : > { %v1161_v20 = vrot.slane %v1003_v40, 4  ;;  %v1073_v41 = vrot.slane %v1031_v17, 4 }
 0x259   : > { %v943_v44 = vpop.f32.mrf.mxu0  ;;  %v971_v45 = vpop.f32.mrf.mxu1 }
 0x25a   : > { %v1162_v63 = vsel %vm1037_vm7, %v1161_v20, %v943_v44  ;;  %v1074_v36 = vsel %vm1037_vm7, %v1073_v41, %v971_v45  ;;  %v1075_v49 = vrot.slane %v971_v45, 4 }
 0x25b   : > { %v1080_v25 = vperm.slane %v1074_v36, %v2093_v0  ;;  %v1166_v58 = vperm.slane %v1162_v63, %v2093_v0 }
 0x25c   : > { %v1076_v46 = vsel %vm1037_vm7, %v1031_v17, %v1075_v49 }
 0x25d   : > { %v1084_v51 = vperm.slane %v1076_v46, %v2093_v0  ;;  %v1109_v39 = vrot.slane %v1080_v25, 4  ;;  %v1112_v59 = vsel %vm1037_vm7, %v1080_v25, %v1111_v54  ;;  %v1187_v37 = vrot.slane %v1166_v58, 4 }
 0x25e   : > { %v1120_v2 = vperm.slane %v1112_v59, %v2104_v42 }
 0x25f   : > { %v1110_v5 = vsel %vm1037_vm7, %v1109_v39, %v1068_v38  ;;  %v1121_v7 = vrot.slane %v1084_v51, 4  ;;  %v1124_v53 = vsel %vm1037_vm7, %v1084_v51, %v1123_v57  ;;  %v1033_v6 = vpop.f32.mrf.mxu3 }
 0x260   : > { %v1116_v47 = vperm.slane %v1110_v5, %v2104_v42  ;;  %v1132_v9 = vperm.slane %v1124_v53, %v2104_v42  ;;  %v1137_v10 = vrot.slane %v1120_v2, 4  ;;  %v1140_v11 = vsel %vm1037_vm7, %v1120_v2, %v1139_v55 }
 0x261   : > { %v1122_v12 = vsel %vm1037_vm7, %v1121_v7, %v1072_v60  ;;  %v1215_v16 = vrot.slane %v1140_v11, 4  ;;  %v1167_v18 = vrot.slane %v1033_v6, 4  ;;  %v973_v19 = vpop.f32.mrf.mxu1 }
 0x262   : > { %v1128_v22 = vperm.slane %v1122_v12, %v2104_v42  ;;  %v1133_v14 = vrot.slane %v1116_v47, 4  ;;  %v1136_v15 = vsel %vm1037_vm7, %v1116_v47, %v1135_v61  ;;  %v1138_v31 = vsel %vm1037_vm7, %v1137_v10, %v1096_v21 }
 0x263   : > { %v1145_v23 = vrot.slane %v1132_v9, 4  ;;  %v1148_v8 = vsel %vm1037_vm7, %v1132_v9, %v1147_v56  ;;  %v1203_v24 = vrot.slane %v1138_v31, 4  ;;  %v1217_v26 = vrot.slane %v1136_v15, 4 }
 0x264   : > { %v1134_v4 = vsel %vm1037_vm7, %v1133_v14, %v1092_v48  ;;  %v1141_v28 = vrot.slane %v1128_v22, 4  ;;  %v1239_v29 = vrot.slane %v1148_v8, 4  ;;  %v1168_v30 = vsel %vm1037_vm7, %v1167_v18, %v973_v19 }
 0x265   : > { %v1172_v32 = vperm.slane %v1168_v30, %v2093_v0  ;;  %v1144_v33 = vsel %vm1037_vm7, %v1128_v22, %v1143_v62  ;;  %v1146_v34 = vsel %vm1037_vm7, %v1145_v23, %v1108_v13  ;;  %v1204_v35 = vsel %vm1037_vm7, %v1203_v24, %v1134_v4 }
 0x266   : > { %v1142_v38 = vsel %vm1037_vm7, %v1141_v28, %v1104_v43  ;;  %v1210_v40 = vperm.slane %v1204_v35, %v2093_v0  ;;  %v1216_v17 = vsel %vm1037_vm7, %v1215_v16, %v1136_v15  ;;  %v1227_v21 = vrot.slane %v1146_v34, 4 }
 0x267   : > { %v1185_v60 = vrot.slane %v1172_v32, 4  ;;  %v1188_v20 = vsel %vm1037_vm7, %v1172_v32, %v1187_v37  ;;  %v1222_v41 = vperm.slane %v1216_v17, %v2093_v0  ;;  %v1229_v27 = vrot.slane %v1142_v38, 4 }
 0x268   : > { %v1196_v44 = vperm.slane %v1188_v20, %v2104_v42  ;;  %v1228_v45 = vsel %vm1037_vm7, %v1227_v21, %v1142_v38  ;;  %v1240_v13 = vsel %vm1037_vm7, %v1239_v29, %v1144_v33  ;;  %v1241_v48 = vrot.slane %v1144_v33, 4 }
 0x269   : > { %v1186_v43 = vsel %vm1037_vm7, %v1185_v60, %v1166_v58  ;;  %v1234_v63 = vperm.slane %v1228_v45, %v2093_v0  ;;  %v1246_v36 = vperm.slane %v1240_v13, %v2093_v0  ;;  %v1251_v49 = vrot.slane %v1222_v41, 4 }
 0x26a   : > { %v1192_v50 = vperm.slane %v1186_v43, %v2104_v42  ;;  %v1201_v52 = vrot.slane %v1196_v44, 4  ;;  %v1205_v54 = vrot.slane %v1134_v4, 4  ;;  %v1218_v25 = vsel %vm1037_vm7, %v1140_v11, %v1217_v26 }
 0x26b   : > { %v1252_v55 = vsel %vm1037_vm7, %v1251_v49, %v1210_v40  ;;  %v1275_v56 = vrot.slane %v1246_v36, 4  ;;  %v1226_v57 = vperm.slane %v1218_v25, %v2093_v0  ;;  %v1230_v46 = vsel %vm1037_vm7, %v1146_v34, %v1229_v27 }
 0x26c   : > { %v1180_v58 = vperm.slane %v1174_v3, %v2104_v42  ;;  %v1197_v51 = vrot.slane %v1192_v50, 4  ;;  %v1258_v39 = vperm.slane %v1252_v55, %v2104_v42  ;;  %v1206_v59 = vsel %vm1037_vm7, %v1138_v31, %v1205_v54 }
 0x26d   : > { %v1202_v61 = vsel %vm1037_vm7, %v1201_v52, %v1184_v1  ;;  %v1276_v62 = vsel %vm1037_vm7, %v1275_v56, %v1234_v63  ;;  %v1214_v2 = vperm.slane %v1206_v59, %v2093_v0  ;;  %v1238_v5 = vperm.slane %v1230_v46, %v2093_v0 }
 0x26e   : > { %v1282_v7 = vperm.slane %v1276_v62, %v2104_v42  ;;  %v1301_v53 = vrot.slane %v1258_v39, 4  ;;  %v1242_v6 = vsel %vm1037_vm7, %v1148_v8, %v1241_v48  ;;  %v1263_v47 = vrot.slane %v1226_v57, 4 }
 0x26f   : > { %v1250_v3 = vperm.slane %v1242_v6, %v2093_v0  ;;  %v1265_v9 = vrot.slane %v1214_v2, 4  ;;  %v1289_v10 = vrot.slane %v1238_v5, 4  ;;  %v1253_v11 = vrot.slane %v1210_v40, 4 }
 0x270   : > { %v1315_v37 = vrot.slane %v1202_v61, 4  ;;  %v1302_v1 = vsel %vm1037_vm7, %v1282_v7, %v1301_v53  ;;  %v1264_v12 = vsel %vm1037_vm7, %v1263_v47, %v1214_v2  ;;  %v1277_v16 = vrot.slane %v1234_v63, 4 }
 0x271   : > { %1371 = vrot.lane.b32.xlu2 %v1302_v1, %s1746_s30  ;;  %v1270_v18 = vperm.slane %v1264_v12, %v2104_v42  ;;  %v1287_v19 = vrot.slane %v1250_v3, 4  ;;  %v1266_v22 = vsel %vm1037_vm7, %v1226_v57, %v1265_v9  ;;  %v1290_v14 = vsel %vm1037_vm7, %v1250_v3, %v1289_v10 }
 0x272   : > { %v2184_v15 = vperm.slane %v1266_v22, %v2104_v42  ;;  %v2187_v31 = vperm.slane %v1290_v14, %v2104_v42  ;;  %v1199_v23 = vrot.slane %v1180_v58, 4  ;;  %v1254_v26 = vsel %vm1037_vm7, %v1222_v41, %v1253_v11 }
 0x273   : > { %v1288_v8 = vsel %vm1037_vm7, %v1287_v19, %v1238_v5  ;;  %v1309_v24 = vrot.slane %v1270_v18, 4  ;;  %v1278_v4 = vsel %vm1037_vm7, %v1246_v36, %v1277_v16  ;;  %v1198_v30 = vsel %vm1037_vm7, %v1197_v51, %v1180_v58 }
 0x274   : > { %v1294_v28 = vperm.slane %v1288_v8, %v2104_v42  ;;  %v1311_v29 = vrot.slane %v2187_v31, 4  ;;  %v1200_v32 = vsel %vm1037_vm7, %v1192_v50, %v1199_v23  ;;  %v1299_v33 = vrot.slane %v1282_v7, 4 }
 0x275   : > { %v1316_v34 = vsel %vm1037_vm7, %v1315_v37, %v1198_v30  ;;  %v1317_v35 = vrot.slane %v1198_v30, 4  ;;  %v1262_v17 = vperm.slane %v1254_v26, %v2104_v42  ;;  %v1286_v60 = vperm.slane %v1278_v4, %v2104_v42 }
 0x276   : > { %v1307_v38 = vrot.slane %v1294_v28, 4  ;;  %v1312_v40 = vsel %vm1037_vm7, %v1311_v29, %v2184_v15  ;;  %v1322_v21 = vperm.slane %v1316_v34, %v2093_v0  ;;  %v1327_v20 = vrot.slane %v1200_v32, 4 }
 0x277   : > { %1411 = vrot.lane.b32.xlu0 %v1312_v40, %s1747_s5  ;;  %v1310_v27 = vsel %vm1037_vm7, %v1294_v28, %v1309_v24  ;;  %v1318_v45 = vsel %vm1037_vm7, %v1202_v61, %v1317_v35  ;;  %v1300_v48 = vsel %vm1037_vm7, %v1299_v33, %v1258_v39  ;;  %v1305_v43 = vrot.slane %v1262_v17, 4 }
 0x278   : > { %v1308_v41 = vsel %vm1037_vm7, %v1307_v38, %v1270_v18  ;;  %v1339_v44 = vrot.slane %v1322_v21, 4  ;;  %v1328_v13 = vsel %vm1037_vm7, 0.0, %v1327_v20  ;;  %v1332_v63 = vperm.slane %v1200_v32, %v2093_v0 }
 0x279   : > { %1395 = vrot.lane.b32.xlu1 %v1308_v41, %s1748_s6  ;;  %1403 = vrot.lane.b32.xlu2 %v1310_v27, %s1749_s7  ;;  %v1326_v36 = vperm.slane %v1318_v45, %v2093_v0  ;;  %v1336_v49 = vperm.slane %v1328_v13, %v2093_v0  ;;  %v1303_v50 = vrot.slane %v1286_v60, 4  ;;  %v1306_v25 = vsel %vm1037_vm7, %v1286_v60, %v1305_v43 }
 0x27a   : > { %v1340_v52 = vsel %vm1037_vm7, %v1332_v63, %v1339_v44  ;;  %v1337_v57 = vrot.slane %v1332_v63, 4  ;;  %v1313_v53 = vrot.slane %v2184_v15, 4 }
 0x27b   : > { %v1349_v54 = vrot.slane %v1336_v49, 4  ;;  %v1348_v56 = vperm.slane %v1340_v52, %v2104_v42  ;;  %v1304_v46 = vsel %vm1037_vm7, %v1303_v50, %v1262_v17  ;;  %v1351_v61 = vrot.slane %v1326_v36, 4 }
 0x27c   : > { %v1338_v0 = vsel %vm1037_vm7, %v1337_v57, %v1322_v21  ;;  %v1314_v3 = vsel %vm1037_vm7, %v2187_v31, %v1313_v53 }
 0x27d   : > { %v1350_v55 = vsel %vm1037_vm7, %v1349_v54, %v1326_v36  ;;  %v1363_v39 = vrot.slane %v1348_v56, 4  ;;  %v1344_v59 = vperm.slane %v1338_v0, %v2104_v42  ;;  %v1352_v7 = vsel %vm1037_vm7, %v1336_v49, %v1351_v61 }
 0x27e   : > { %v1356_v58 = vperm.slane %v1350_v55, %v2104_v42  ;;  %v1360_v47 = vperm.slane %v1352_v7, %v2104_v42 }
 0x27f   : > { %1387 = vrot.lane.b32.xlu0 %v1306_v25, %s1750_s8  ;;  %v1364_v2 = vsel %vm1037_vm7, 0.0, %v1363_v39  ;;  %v1361_v5 = vrot.slane %v1344_v59, 4 }
 0x280   : > { %v1365_v51 = vrot.slane %v1356_v58, 4  ;;  %v1367_v9 = vrot.slane %v1360_v47, 4 }
 0x281   : > { %1379 = vrot.lane.b32.xlu1 %v1304_v46, %s1751_s9  ;;  %1381 = vrot.lane.b32.xlu2 %v1348_v56, %s1751_s9  ;;  %v1362_v6 = vsel %vm1037_vm7, 0.0, %v1361_v5 }
 0x282   : > { %v1366_v62 = vsel %vm1037_vm7, 0.0, %v1365_v51  ;;  %v1368_v10 = vsel %vm1037_vm7, 0.0, %v1367_v9 }
 0x287   : > { %1397 = vrot.lane.b32.xlu0 %v1356_v58, %s1748_s6 }
 0x289   : > { %1405 = vrot.lane.b32.xlu1 %v1366_v62, %s1749_s7  ;;  %1389 = vrot.lane.b32.xlu2 %v1364_v2, %s1750_s8 }
 0x28f   : > { %1373 = vrot.lane.b32.xlu0 %v1362_v6, %s1746_s30 }
 0x291   : > { %1419 = vrot.lane.b32.xlu1 %v1314_v3, %s1752_s10  ;;  %1413 = vrot.lane.b32.xlu2 %v1360_v47, %s1747_s5 }
 0x297   : > { %1421 = vrot.lane.b32.xlu0 %v1368_v10, %s1752_s10 }
 0x2cb   : > { %v1372_v11 = vpop.permute.xlu2 %1371 }
 0x2cc   : > { %v1425_v19 = vsel %vm360_vm0, %v1300_v48, %v1372_v11 }
 0x2d3   : > { %v1404_v1 = vpop.permute.xlu2 %1403 }
 0x2db   : > { %v1382_v18 = vpop.permute.xlu2 %1381 }
 0x2e3   : > { %v1390_v8 = vpop.permute.xlu2 %1389 }
 0x2e9   : > { %v1412_v37 = vpop.permute.xlu0 %1411 }
 0x2eb   : > { %v1396_v12 = vpop.permute.xlu1 %1395  ;;  %v1414_v38 = vpop.permute.xlu2 %1413 }
 0x2f1   : > { %v1388_v16 = vpop.permute.xlu0 %1387 }
 0x2f3   : > { %v1380_v42 = vpop.permute.xlu1 %1379 }
 0x2f4   : > { %v1428_v22 = vsel %vm1427_vm8, %v1425_v19, %v1380_v42 }
 0x2f5   : > { %v1431_v15 = vsel %vm1430_vm9, %v1428_v22, %v1388_v16 }
 0x2f6   : > { %v1434_v23 = vsel %vm1433_vm10, %v1431_v15, %v1396_v12 }
 0x2f7   : > { %v1437_v24 = vsel %vm1436_vm11, %v1434_v23, %v1404_v1 }
 0x2f8   : > { %v1440_v28 = vsel %vm1439_vm12, %v1437_v24, %v1412_v37 }
 0x2f9   : > { %v1398_v14 = vpop.permute.xlu0 %1397 }
 0x2fb   : > { %v1406_v31 = vpop.permute.xlu1 %1405 }
 0x301   : > { %v1374_v26 = vpop.permute.xlu0 %1373 }
 0x302   : > { %v1426_v4 = vsel %vm360_vm0, %v1344_v59, %v1374_v26 }
 0x303   : > { %v1420_v29 = vpop.permute.xlu1 %1419  ;;  %v1429_v30 = vsel %vm1427_vm8, %v1426_v4, %v1382_v18 }
 0x304   : > { %v1443_v32 = vsel %vm1442_vm13, %v1440_v28, %v1420_v29  ;;  %v1432_v33 = vsel %vm1430_vm9, %v1429_v30, %v1390_v8 }
 0x305   : > { %1445 = vst [vmem:[%s251_s14] sm:$0xff] %v1443_v32  ;;  %v1435_v34 = vsel %vm1433_vm10, %v1432_v33, %v1398_v14 }
 0x306   : > { %v1438_v35 = vsel %vm1436_vm11, %v1435_v34, %v1406_v31 }
 0x307   : > { %v1441_v40 = vsel %vm1439_vm12, %v1438_v35, %v1414_v38 }
 0x309   : > { %v1422_v17 = vpop.permute.xlu0 %1421 }
 0x30a   : > { %v1444_v21 = vsel %vm1442_vm13, %v1441_v40, %v1422_v17 }
 0x30b   : > { %1446 = vst [vmem:[%s251_s14 + $0x8] sm:$0x7] %v1444_v21 }
 0x30c PF: > { %s14_s15 = sadd.s32 1, %s1740_s15  }
 0x30d   : > { %p11_p4 = scmp.ge.s32.totalorder %s14_s15, 4  }
 0x30f   :  { %13 = sbr.rel (!%p11_p4) target bundleno = 1 (0x1), region = 75 }

</bundles_post_ra>
